<compile_context>
chip_gen: v6e
topology: v6e:2x2x1
jax: 0.10.0
libtpu: 0.0.40
codegen_flags: <defaults>
</compile_context>

<pallas_src>
import functools

import jax
import jax.numpy as jnp
from jax.experimental import pallas as pl
from jax.experimental.pallas import tpu as pltpu


# ----------------------------- Pallas kernel --------------------------------

def _moe_expert_kernel(active_ref, fetch_ref, x_ref, wgu_ref, wd_ref, gate_ref,
                       out_ref, *, num_experts, inter_tile):
    """Grid = (token_tiles, inter_tiles, experts); expert axis innermost.

    out_ref block (tm, H) f32 is resident across (ki, e): zero it on the first
    reduction step and accumulate directly into it (no scratch, no final copy).
    """
    t = pl.program_id(0)
    ki = pl.program_id(1)
    e = pl.program_id(2)

    @pl.when((ki == 0) & (e == 0))
    def _():
        out_ref[...] = jnp.zeros_like(out_ref)

    # Skip compute entirely for experts no token in this tile routed to.
    @pl.when(active_ref[t * num_experts + e] != 0)
    def _():
        x = x_ref[...]                                                   # (tm, H) bf16
        # Fused gate|up projection: one MXU stream of width 2*ti.
        gu = jnp.dot(x, wgu_ref[0], preferred_element_type=jnp.float32)  # (tm, 2*ti)
        g = gu[:, :inter_tile]
        u = gu[:, inter_tile:]
        h = (g * jax.nn.sigmoid(g)) * u                                  # SiLU(g) * u
        # Fold the per-token combine weight into h before the down-proj so the
        # weighted accumulation is free (no extra (tm, H) elementwise pass).
        w = gate_ref[0]                                                  # (tm, 1) f32
        hw = (h * w).astype(wd_ref.dtype)                                # (tm, ti) bf16
        out_ref[...] += jnp.dot(hw, wd_ref[0],
                                preferred_element_type=jnp.float32)      # (tm, H) f32


# ------------------------------ tiling helpers -------------------------------

def _tpu_vmem_capacity_bytes():
    try:
        info = pltpu.get_tpu_info()
        return int(getattr(info, "vmem_capacity_bytes", 64 << 20))
    except Exception:
        return 64 << 20   # conservative (v7x-sized) fallback


def _choose_tiles(n, h, inter, token_tile=None, inter_tile=None):
    """Generation-aware tile choice.

    Token tile: prefer 256 (v6e/v7x 256-wide MXU) but only if N/256 >= 2 so the
    v7x 2-TC "parallel" axis still shards; otherwise 128; otherwise full N.
    Intermediate tile: largest of (1024, 512, 256, 128) dividing I that fits
    the VMEM budget ~ 12*H*ti (double-buffered bf16 fused weights + down-proj)
    + 16*tm*H (x + resident f32 output); otherwise full I.
    """
    vmem_budget = int(_tpu_vmem_capacity_bytes() * 0.80)

    if token_tile is None:
        tm = None
        for c in (256, 128):
            if n % c == 0 and (c != 256 or n // c >= 2):
                tm = c
                break
        if tm is None:
            tm = n
    else:
        tm = token_tile
    if n % tm != 0:
        raise ValueError(f"token tile {tm} must divide N={n}")
    if tm % 8 != 0:
        raise ValueError(f"token tile {tm} must be a multiple of 8")

    if inter_tile is None:
        ti = None
        for c in (1024, 512, 256, 128):
            if inter % c == 0 and 12 * h * c + 16 * tm * h <= vmem_budget:
                ti = c
                break
        if ti is None:
            ti = inter
    else:
        ti = inter_tile
    if inter % ti != 0:
        raise ValueError(f"intermediate tile {ti} must divide I={inter}")
    return tm, ti


def prepare_expert_weights(params, inter_tile):
    """One-time (outside jit) weight prep: bf16 cast + gate/up fusion.

    Returns wgu of shape (E, H, 2I) where the last axis is interleaved per
    intermediate tile: block ki covers [gate cols ki*ti:(ki+1)*ti | up cols
    ki*ti:(ki+1)*ti] contiguously, matching the kernel's (1, H, 2*ti) block.
    """
    wg, wu, wd = params["wg"], params["wu"], params["wd"]
    e_total, h, inter = wg.shape
    ti = inter_tile
    num_ki = inter // ti
    wg4 = wg.reshape(e_total, h, num_ki, ti)
    wu4 = wu.reshape(e_total, h, num_ki, ti)
    wgu = jnp.concatenate([wg4, wu4], axis=-1).reshape(e_total, h, 2 * inter)
    return dict(wgu=wgu.astype(jnp.bfloat16), wd=wd.astype(jnp.bfloat16))


# ------------------------------ Pallas wrapper --------------------------------

def moe_experts(x_bf16, wgu_all, wd_all, gate_w, active, fetch,
                *, token_tile, inter_tile):
    """Weighted sum of expert MLPs with per-tile expert skipping.

    x_bf16  : (N, H)      bf16
    wgu_all : (E, H, 2I)  bf16   fused [gate | up] per intermediate tile
    wd_all  : (E, I, H)   bf16   down_proj, stored (in, out)
    gate_w  : (E, N, 1)   f32    per-(expert, token) combine weight (sublane layout)
    active  : (T*E,)      int32  1 iff expert active for that token tile
    fetch   : (T*E,)      int32  expert index to fetch (repeats previous if inactive)
    """
    n, h = x_bf16.shape
    e_total = wgu_all.shape[0]
    inter = wd_all.shape[1]
    tm, ti = token_tile, inter_tile
    num_t, num_ki = n // tm, inter // ti

    kernel = functools.partial(_moe_expert_kernel,
                               num_experts=e_total, inter_tile=ti)

    grid_spec = pltpu.PrefetchScalarGridSpec(
        num_scalar_prefetch=2,
        grid=(num_t, num_ki, e_total),
        in_specs=[
            # x: one block per token tile, resident across (ki, e)
            pl.BlockSpec((tm, h), lambda t, ki, e, act, fet: (t, 0)),
            # fused gate|up weights: dedup fetch index skips DMA for inactive experts
            pl.BlockSpec((1, h, 2 * ti),
                         lambda t, ki, e, act, fet: (fet[t * e_total + e], 0, ki)),
            # down_proj weights
            pl.BlockSpec((1, ti, h),
                         lambda t, ki, e, act, fet: (fet[t * e_total + e], ki, 0)),
            # combine weights in sublane orientation: (1, tm, 1) -> no transpose
            pl.BlockSpec((1, tm, 1), lambda t, ki, e, act, fet: (e, t, 0)),
        ],
        # output block resident across (ki, e): accumulated in place in the kernel
        out_specs=pl.BlockSpec((tm, h), lambda t, ki, e, act, fet: (t, 0)),
    )

    vmem_cap = _tpu_vmem_capacity_bytes()
    vmem_limit = max(32 << 20, min(int(vmem_cap * 0.85), vmem_cap - (8 << 20)))

    return pl.pallas_call(
        kernel,
        grid_spec=grid_spec,
        out_shape=jax.ShapeDtypeStruct((n, h), jnp.float32),
        compiler_params=pltpu.CompilerParams(
            dimension_semantics=("parallel", "arbitrary", "arbitrary"),
            vmem_limit_bytes=vmem_limit),
    )(active, fetch, x_bf16, wgu_all, wd_all, gate_w)


def moe_feed_forward(x, router_params, expert_weights, *, num_shared, top_k,
                     token_tile, inter_tile):
    """Full MOEFeedForward forward pass. x: (B, T, H) f32."""
    assert num_shared >= 1, "fetch-dedup relies on shared experts (index 0) always active"
    orig_shape = x.shape
    hidden = orig_shape[-1]
    x_flat = x.reshape(-1, hidden)
    n = x_flat.shape[0]

    wgu_all, wd_all = expert_weights["wgu"], expert_weights["wd"]
    w_router, routing_bias = router_params["w_router"], router_params["routing_bias"]
    e_total = wgu_all.shape[0]
    e_routed = w_router.shape[1]

    # --- router + top-k gating: tiny (N, E_r) glue, left to XLA -------------
    logits = x_flat @ w_router + routing_bias
    probs = jax.nn.sigmoid(logits)
    topk_probs, topk_idx = jax.lax.top_k(probs, top_k)
    topk_probs = topk_probs / jnp.sum(topk_probs, axis=-1, keepdims=True)

    one_hot = jax.nn.one_hot(topk_idx, e_routed, dtype=jnp.float32)  # (N, k, E_r)
    # Mirrors self.expert_load (module state; not part of the returned output).
    _expert_load = jnp.mean(jnp.sum(one_hot, axis=1), axis=0) / top_k

    # --- combine weights (E, N, 1): shared averaged, routed = normalized prob
    routed_w = jnp.einsum("nke,nk->en", one_hot, topk_probs)         # (E_r, N)
    shared_w = jnp.full((num_shared, n), 1.0 / num_shared, jnp.float32)
    gate_w = jnp.concatenate([shared_w, routed_w], axis=0)[..., None]  # (E, N, 1)

    tm, ti = token_tile, inter_tile
    num_t = n // tm

    # --- per-(token_tile, expert) activity + DMA-dedup fetch index -----------
    tok_sel = jnp.any(one_hot > 0, axis=1)                                # (N, E_r)
    tile_sel = jnp.any(tok_sel.reshape(num_t, tm, e_routed), axis=1)      # (T, E_r)
    active = jnp.concatenate(
        [jnp.ones((num_t, num_shared), dtype=bool), tile_sel], axis=1)    # (T, E)
    flat_active = active.reshape(-1)                                      # (T*E,)
    pos = jnp.arange(num_t * e_total, dtype=jnp.int32)
    last_active = jax.lax.cummax(jnp.where(flat_active, pos, -1), axis=0)
    fetch = (jnp.maximum(last_active, 0) % e_total).astype(jnp.int32)
    active_i32 = flat_active.astype(jnp.int32)

    # --- expert compute: bf16 matmuls, f32 accumulation (single cast of x) ---
    out_flat = moe_experts(
        x_flat.astype(jnp.bfloat16), wgu_all, wd_all,
        gate_w, active_i32, fetch,
        token_tile=tm, inter_tile=ti)
    return out_flat.reshape(orig_shape)


# ---------------------- deterministic parameter init -------------------------

def init_params(key, hidden, intermediate, num_experts, num_shared):
    """Weights stored as (in, out) so the kernel does x @ W (== torch x @ W.T).
    Experts ordered: shared experts first, then routed experts."""
    e_total = num_experts
    e_routed = num_experts - num_shared
    ks = jax.random.split(key, 4)
    bg = 1.0 / jnp.sqrt(hidden)
    bd = 1.0 / jnp.sqrt(intermediate)
    wg = jax.random.uniform(ks[0], (e_total, hidden, intermediate),
                            jnp.float32, -bg, bg)
    wu = jax.random.uniform(ks[1], (e_total, hidden, intermediate),
                            jnp.float32, -bg, bg)
    wd = jax.random.uniform(ks[2], (e_total, intermediate, hidden),
                            jnp.float32, -bd, bd)
    w_router = jax.random.uniform(ks[3], (hidden, e_routed),
                                  jnp.float32, -bg, bg)
    routing_bias = jnp.zeros((e_routed,), jnp.float32)   # torch.zeros init
    return dict(wg=wg, wu=wu, wd=wd, w_router=w_router,
                routing_bias=routing_bias)


# --------------------------- pure-JAX reference -------------------------------

def reference(x, params, *, num_shared, top_k):
    orig_shape = x.shape
    h = orig_shape[-1]
    xf = x.reshape(-1, h)
    wg, wu, wd = params["wg"], params["wu"], params["wd"]
    e_total = wg.shape[0]
    e_routed = params["w_router"].shape[1]

    logits = xf @ params["w_router"] + params["routing_bias"]
    probs = jax.nn.sigmoid(logits)
    tkp, tki = jax.lax.top_k(probs, top_k)
    tkp = tkp / jnp.sum(tkp, axis=-1, keepdims=True)
    oh = jax.nn.one_hot(tki, e_routed, dtype=jnp.float32)
    routed_w = jnp.einsum("nke,nk->en", oh, tkp)
    shared_w = jnp.full((num_shared, xf.shape[0]), 1.0 / num_shared)
    gate_w = jnp.concatenate([shared_w, routed_w], axis=0)

    ys = []
    for e in range(e_total):
        g = xf @ wg[e]
        u = xf @ wu[e]
        ys.append((jax.nn.silu(g) * u) @ wd[e])
    out = jnp.sum(gate_w[:, :, None] * jnp.stack(ys), axis=0)
    return out.reshape(orig_shape)


# --------------------------------- main ---------------------------------------

if __name__ == "__main__":
    # config: hidden_size=32, num_experts=4, num_shared_experts=1, top_k=2,
    #         mlp_ratio=2 -> intermediate_size=64
    hidden, num_experts, num_shared, top_k, mlp_ratio = 32, 4, 1, 2, 2
    intermediate = int(hidden * mlp_ratio)
    batch, seq = 2, 128          # 256 tokens

    key = jax.random.PRNGKey(0)
    kx, kp = jax.random.split(key)
    x = jax.random.normal(kx, (batch, seq, hidden), jnp.float32)
    params = init_params(kp, hidden, intermediate, num_experts, num_shared)

    # Tile choice + weight fusion/cast happen ONCE, outside the jitted forward.
    n_tokens = batch * seq
    tm, ti = _choose_tiles(n_tokens, hidden, intermediate)
    expert_weights = prepare_expert_weights(params, ti)
    expert_weights = jax.tree_util.tree_map(jax.device_put, expert_weights)
    router_params = dict(w_router=params["w_router"],
                         routing_bias=params["routing_bias"])

    fwd = jax.jit(functools.partial(moe_feed_forward,
                                    num_shared=num_shared, top_k=top_k,
                                    token_tile=tm, inter_tile=ti))
    out = fwd(x, router_params, expert_weights)
    jax.block_until_ready(out)

    ref = reference(x, params, num_shared=num_shared, top_k=top_k)
    assert out.shape == x.shape
    max_err = float(jnp.max(jnp.abs(out - ref)))
    # bf16 matmuls with f32 accumulation vs f32 reference -> loose tolerance.
    assert jnp.allclose(out, ref, rtol=5e-2, atol=5e-2), max_err

    print("KERNEL_OK")
</pallas_src>

<mosaic_0001>
module attributes {stable_mosaic.version = 11 : i64} {
  func.func @_moe_expert_kernel(%arg0: i32, %arg1: i32, %arg2: i32, %arg3: memref<8xi32, #tpu.memory_space<smem>>, %arg4: memref<8xi32, #tpu.memory_space<smem>>, %arg5: memref<128x32xbf16, #tpu.memory_space<vmem>>, %arg6: memref<1x32x128xbf16, #tpu.memory_space<vmem>>, %arg7: memref<1x64x32xbf16, #tpu.memory_space<vmem>>, %arg8: memref<1x128x1xf32, #tpu.memory_space<vmem>>, %arg9: memref<128x32xf32, #tpu.memory_space<vmem>>) attributes {dimension_semantics = [#tpu.dimension_semantics<parallel>, #tpu.dimension_semantics<arbitrary>, #tpu.dimension_semantics<arbitrary>], iteration_bounds = array<i64: 2, 1, 4>, scalar_prefetch = 2 : i64, scratch_operands = 0 : i64, tpu.core_type = #tpu.core_type<tc>, window_params = [{transform_indices = @transform_0, window_bounds = array<i64: 128, 32>}, {transform_indices = @transform_1, window_bounds = array<i64: 1, 32, 128>}, {transform_indices = @transform_2, window_bounds = array<i64: 1, 64, 32>}, {transform_indices = @transform_3, window_bounds = array<i64: 1, 128, 1>}, {transform_indices = @transform_4, window_bounds = array<i64: 128, 32>}]} {
    %c0_i32 = arith.constant 0 : i32
    %0 = arith.cmpi eq, %arg1, %c0_i32 : i32
    %c0_i32_0 = arith.constant 0 : i32
    %1 = arith.cmpi eq, %arg2, %c0_i32_0 : i32
    %2 = arith.andi %0, %1 : i1
    %3 = arith.extui %2 : i1 to i32
    %c0_i32_1 = arith.constant 0 : i32
    %4 = arith.cmpi ne, %3, %c0_i32_1 : i32
    scf.if %4 {
      %cst = arith.constant 0.000000e+00 : f32
      %12 = vector.broadcast %cst : f32 to vector<128x32xf32>
      %c0 = arith.constant 0 : index
      %c0_4 = arith.constant 0 : index
      %13 = vector.load %arg9[%c0, %c0_4] : memref<128x32xf32, #tpu.memory_space<vmem>>, vector<128x32xf32>
      tpu.vector_store %arg9[%c0, %c0_4], %12 {strides = array<i32>} : memref<128x32xf32, #tpu.memory_space<vmem>>, vector<128x32xf32>,
    } else {
    }
    %c4_i32 = arith.constant 4 : i32
    %5 = arith.muli %arg0, %c4_i32 : i32
    %6 = arith.addi %5, %arg2 : i32
    %7 = arith.index_cast %6 : i32 to index
    %8 = memref.load %arg3[%7] : memref<8xi32, #tpu.memory_space<smem>>
    %c0_i32_2 = arith.constant 0 : i32
    %9 = arith.cmpi ne, %8, %c0_i32_2 : i32
    %10 = arith.extui %9 : i1 to i32
    %c0_i32_3 = arith.constant 0 : i32
    %11 = arith.cmpi ne, %10, %c0_i32_3 : i32
    scf.if %11 {
      %c0 = arith.constant 0 : index
      %c0_4 = arith.constant 0 : index
      %12 = vector.load %arg5[%c0, %c0_4] : memref<128x32xbf16, #tpu.memory_space<vmem>>, vector<128x32xbf16>
      %c0_5 = arith.constant 0 : index
      %c0_6 = arith.constant 0 : index
      %c0_7 = arith.constant 0 : index
      %13 = vector.load %arg6[%c0_5, %c0_6, %c0_7] : memref<1x32x128xbf16, #tpu.memory_space<vmem>>, vector<1x32x128xbf16>
      %14 = vector.shape_cast %13 : vector<1x32x128xbf16> to vector<32x128xbf16>
      %cst = arith.constant dense<0.000000e+00> : vector<128x128xf32>
      %15 = tpu.matmul %12, %14, %cst {dimension_numbers = #tpu.dot_dimension_numbers<[1], [0], [0], [1], [0, 0, 1, 1], [], []>} : vector<128x32xbf16>, vector<32x128xbf16>, vector<128x128xf32> -> vector<128x128xf32>
      %16 = vector.extract_strided_slice %15 {offsets = [0, 0], sizes = [128, 64], strides = [1, 1]} : vector<128x128xf32> to vector<128x64xf32>
      %17 = vector.extract_strided_slice %15 {offsets = [0, 64], sizes = [128, 64], strides = [1, 1]} : vector<128x128xf32> to vector<128x64xf32>
      %18 = arith.negf %16 : vector<128x64xf32>
      %19 = math.exp %18 : vector<128x64xf32>
      %cst_8 = arith.constant 1.000000e+00 : f32
      %20 = vector.broadcast %cst_8 : f32 to vector<128x64xf32>
      %21 = arith.addf %20, %19 : vector<128x64xf32>
      %22 = arith.divf %20, %21 : vector<128x64xf32>
      %23 = arith.mulf %16, %22 : vector<128x64xf32>
      %24 = arith.mulf %23, %17 : vector<128x64xf32>
      %c0_9 = arith.constant 0 : index
      %c0_10 = arith.constant 0 : index
      %c0_11 = arith.constant 0 : index
      %25 = vector.load %arg8[%c0_9, %c0_10, %c0_11] : memref<1x128x1xf32, #tpu.memory_space<vmem>>, vector<1x128x1xf32>
      %26 = vector.shape_cast %25 : vector<1x128x1xf32> to vector<128x1xf32>
      %27 = vector.broadcast %26 : vector<128x1xf32> to vector<128x64xf32>
      %28 = arith.mulf %24, %27 : vector<128x64xf32>
      %29 = arith.truncf %28 : vector<128x64xf32> to vector<128x64xbf16>
      %c0_12 = arith.constant 0 : index
      %c0_13 = arith.constant 0 : index
      %30 = vector.load %arg9[%c0_12, %c0_13] : memref<128x32xf32, #tpu.memory_space<vmem>>, vector<128x32xf32>
      %c0_14 = arith.constant 0 : index
      %c0_15 = arith.constant 0 : index
      %c0_16 = arith.constant 0 : index
      %31 = vector.load %arg7[%c0_14, %c0_15, %c0_16] : memref<1x64x32xbf16, #tpu.memory_space<vmem>>, vector<1x64x32xbf16>
      %32 = vector.shape_cast %31 : vector<1x64x32xbf16> to vector<64x32xbf16>
      %cst_17 = arith.constant dense<0.000000e+00> : vector<128x32xf32>
      %33 = tpu.matmul %29, %32, %cst_17 {dimension_numbers = #tpu.dot_dimension_numbers<[1], [0], [0], [1], [0, 0, 1, 1], [], []>} : vector<128x64xbf16>, vector<64x32xbf16>, vector<128x32xf32> -> vector<128x32xf32>
      %34 = arith.addf %30, %33 : vector<128x32xf32>
      %c0_18 = arith.constant 0 : index
      %c0_19 = arith.constant 0 : index
      %35 = vector.load %arg9[%c0_18, %c0_19] : memref<128x32xf32, #tpu.memory_space<vmem>>, vector<128x32xf32>
      tpu.vector_store %arg9[%c0_18, %c0_19], %34 {strides = array<i32>} : memref<128x32xf32, #tpu.memory_space<vmem>>, vector<128x32xf32>,
    } else {
    }
    return
  }
  func.func @transform_0(%arg0: i32, %arg1: i32, %arg2: i32, %arg3: memref<8xi32, #tpu.memory_space<smem>>, %arg4: memref<8xi32, #tpu.memory_space<smem>>) -> (i32, i32) {
    %c0_i32 = arith.constant 0 : i32
    %c0_i32_0 = arith.constant 0 : i32
    return %arg0, %c0_i32 : i32, i32
  }
  func.func @transform_1(%arg0: i32, %arg1: i32, %arg2: i32, %arg3: memref<8xi32, #tpu.memory_space<smem>>, %arg4: memref<8xi32, #tpu.memory_space<smem>>) -> (i32, i32, i32) {
    %c4_i32 = arith.constant 4 : i32
    %0 = arith.muli %arg0, %c4_i32 : i32
    %1 = arith.addi %0, %arg2 : i32
    %2 = arith.index_cast %1 : i32 to index
    %3 = memref.load %arg4[%2] : memref<8xi32, #tpu.memory_space<smem>>
    %c0_i32 = arith.constant 0 : i32
    %c0_i32_0 = arith.constant 0 : i32
    return %3, %c0_i32, %arg1 : i32, i32, i32
  }
  func.func @transform_2(%arg0: i32, %arg1: i32, %arg2: i32, %arg3: memref<8xi32, #tpu.memory_space<smem>>, %arg4: memref<8xi32, #tpu.memory_space<smem>>) -> (i32, i32, i32) {
    %c4_i32 = arith.constant 4 : i32
    %0 = arith.muli %arg0, %c4_i32 : i32
    %1 = arith.addi %0, %arg2 : i32
    %2 = arith.index_cast %1 : i32 to index
    %3 = memref.load %arg4[%2] : memref<8xi32, #tpu.memory_space<smem>>
    %c0_i32 = arith.constant 0 : i32
    %c0_i32_0 = arith.constant 0 : i32
    return %3, %arg1, %c0_i32 : i32, i32, i32
  }
  func.func @transform_3(%arg0: i32, %arg1: i32, %arg2: i32, %arg3: memref<8xi32, #tpu.memory_space<smem>>, %arg4: memref<8xi32, #tpu.memory_space<smem>>) -> (i32, i32, i32) {
    %c0_i32 = arith.constant 0 : i32
    %c0_i32_0 = arith.constant 0 : i32
    return %arg2, %arg0, %c0_i32 : i32, i32, i32
  }
  func.func @transform_4(%arg0: i32, %arg1: i32, %arg2: i32, %arg3: memref<8xi32, #tpu.memory_space<smem>>, %arg4: memref<8xi32, #tpu.memory_space<smem>>) -> (i32, i32) {
    %c0_i32 = arith.constant 0 : i32
    %c0_i32_0 = arith.constant 0 : i32
    return %arg0, %c0_i32 : i32, i32
  }
}

</mosaic_0001>

<bundles_post_ra>
// kernel: moe_feed_forward.1
= control target key start
LH: loop header
LB: loop body
LE: loop exit
PB: predicated region body
PF: predicated region fallthrough
CT: control target
= control target key end

     0   :  { %s1963_s0 = inlined_call_operand.vmem [shape: s32[8], index: 0, kind: input, shape index: {}]   ;;  %s1964_s2 = inlined_call_operand.vmem [shape: bf16[256,32], index: 2, kind: input, shape index: {}]   ;;  %s1965_s3 = inlined_call_operand.vmem [shape: bf16[4,32,128], index: 3, kind: input, shape index: {}]   ;;  %s1966_s4 = inlined_call_operand.vmem [shape: bf16[4,64,32], index: 4, kind: input, shape index: {}]   ;;  %s1967_s5 = inlined_call_operand.vmem [shape: f32[4,256,1], index: 5, kind: input, shape index: {}]   ;;  %s1968_s6 = inlined_call_operand.vmem [shape: f32[256,32], index: 6, kind: output, shape index: {}]   ;;  %s1969_s1 = inlined_call_operand.vmem [shape: s32[8], index: 1, kind: input, shape index: {}]  }
   0x1   :  { %s11_s23 = sshll.u32 %s1963_s0, 4  ;;  %s15_s26 = sshll.u32 %s1969_s1, 4  ;;  %s12_s23 = int_to_ptr.vmem [resolvable:$true] %s11_s23  ;;  %s16_s26 = int_to_ptr.vmem [resolvable:$true] %s15_s26 }
   0x2   :  { %s1508_s27 = scalar_lea.vmem %s12_s23, 16  ;;  %p1513_p1 = scmp.lt.s32.totalorder %s12_s23, %s12_s23 }
   0x3   :  { %p1509_p0 = scmp.ne.s32.totalorder %s12_s23, %s1508_s27  ;;  %p1514_p2 = scmp.lt.s32.totalorder %s1508_s27, %s1508_s27 }
   0x5   :  { %p1515_p3 = por %p1514_p2, %p1513_p1 }
   0x7   :  { %p1516_p4 = pnand %p1515_p3, %p1509_p0 }
   0x9   :  { %1519 = shalt.err (!%p1516_p4)  }
   0xa   :  { %s1574_s28 = smov [#allocation3]   ;;  %s1520_s29 = scalar_lea.vmem %s16_s26, 16 }
   0xb   :  { %14 = dma.vmem_to_smem %s12_s23, 16, %s1574_s28, [#allocation2] }
   0xc   :  { %p1521_p5 = scmp.ne.s32.totalorder %s16_s26, %s1520_s29  ;;  %p1525_p6 = scmp.lt.s32.totalorder %s16_s26, %s16_s26 }
   0xd   :  { %p1526_p7 = scmp.lt.s32.totalorder %s1520_s29, %s1520_s29 }
   0xf   :  { %p1527_p8 = por %p1526_p7, %p1525_p6 }
  0x11   :  { %p1528_p9 = pnand %p1527_p8, %p1521_p5 }
  0x13   :  { %1531 = shalt.err (!%p1528_p9)  }
  0x14   :  { %s1575_s0 = smov [#allocation4]  }
  0x15   :  { %18 = dma.vmem_to_smem %s16_s26, 16, %s1575_s0, [#allocation2] }
  0x16   :  { %1552 = dma.done.wait [#allocation2], 32 }
  0x17   :  { %1553 = vsyncadd [#allocation2], 4294967264 }
  0x18   :  { %20 = sfence }
  0x19   :  { %s1620_s1 = smov 0   ;;  %s1622_s30 = smov 0  }
  0x1a   :  { %s1624_s7 = smov 0   ;;  %s1626_s8 = smov 0  }
  0x1b   :  { %s1628_s9 = smov 0  }
  0x1c LB: > { %s38_s10 = sadd.s32 1, %s1564_s7  ;;  %s45_s11 = sadd.s32 1, %s1568_s8  ;;  %s1572_s9 = sphi %s1628_s9, %s26_s9   ;;  %s1568_s8 = sphi %s1626_s8, %s1973_s8   ;;  %s1564_s7 = sphi %s1624_s7, %s1972_s7   ;;  %s1560_s30 = sphi %s1622_s30, %s1971_s30   ;;  %s1556_s1 = sphi %s1620_s1, %s1970_s1  }
  0x1d   : > { %p39_p10 = scmp.ge.s32.totalorder %s38_s10, 4  ;;  %p1249_p11 = scmp.ge.s32.totalorder %s1572_s9, 1 }
  0x1e   : > { %p267_p12 = scmp.lt.s32.totalorder %s1572_s9, 9 }
  0x1f   : > { %s1975_s10 = smov (%p39_p10, %s38_s10), 0  ;;  %s1977_s11 = smov (!%p39_p10, %s45_s11), %s1568_s8 }
  0x20   : > { %p268_p13 = pnand %p1249_p11, %p267_p12  ;;  %p47_p0 = scmp.ge.s32.totalorder %s1977_s11, 2 }
  0x21   : > { %s1250_s12 = sshll.u32 (!%p268_p13), %s1560_s30, 4  ;;  %s1252_s13 = sshll.u32 (!%p268_p13), %s1560_s30, 2 }
  0x22   : > { %s1979_s11 = smov (%p47_p0, %s1977_s11), 0  ;;  %271 = sbr.rel (%p268_p13) target bundleno = 636 (0x27c), region = 36 }
  0x23   : > { %p326_p1 = scmp.lt.s32.totalorder (!%p268_p13), %s1250_s12, 31  ;;  %s1653_s14 = sadd.s32 (!%p268_p13), %s1556_s1, %s1252_s13 }
  0x24   : > { %s333_s15 = sld [smem:[#allocation4 + %s1653_s14]] (!%p268_p13)  ;;  %p362_p2 = scmp.lt.s32.totalorder (!%p268_p13), %s1556_s1, 3 }
  0x25   : > { %s347_s16 = sld [smem:[#allocation4 + %s1653_s14]] (!%p268_p13)  ;;  %p379_p3 = scmp.eq.s32.totalorder (!%p268_p13), %s1556_s1, 0 }
  0x27   : > { %s1981_s12 = smov (!%p326_p1, %s1250_s12), 31  ;;  %vm384_vm0 = vcmask (%p379_p3), 261120   ;;  %v1576_v0 = vmov (%p379_p3), 0.0  }
  0x28   : > { %s1251_s17 = sshll.u32 %s1981_s12, 2  ;;  %s1262_s18 = sshll.u32 %s1981_s12, 3 }
  0x29   : > { %s1662_s21 = scalar_lea.vmem %s1964_s2, %s1251_s17  ;;  %s1667_s24 = scalar_lea.vmem %s1968_s6, %s1262_s18 }
  0x2a   : > { %s363_s25 = scalar_select %p362_p2, %s1556_s1, 3  ;;  %385 = vst.msk [vmem:[%s1667_s24] sm:$0xff] (%p379_p3), %vm384_vm0, %v1576_v0  ;;  %386 = vst.msk [vmem:[%s1667_s24 + $0x8] sm:$0xff] (%p379_p3), %vm384_vm0, %v1576_v0 }
  0x2b   : > { %p334_p4 = scmp.lt.s32.totalorder %s333_s15, 3  ;;  %p349_p5 = scmp.lt.s32.totalorder %s347_s16, 3  ;;  %387 = vst.msk [vmem:[%s1667_s24 + $0x10] sm:$0xff] (%p379_p3), %vm384_vm0, %v1576_v0  ;;  %388 = vst.msk [vmem:[%s1667_s24 + $0x18] sm:$0xff] (%p379_p3), %vm384_vm0, %v1576_v0 }
  0x2c   : > { %s1259_s26 = sshll.u32 %s363_s25, 5  ;;  %389 = vst.msk [vmem:[%s1667_s24 + $0x20] sm:$0xff] (%p379_p3), %vm384_vm0, %v1576_v0  ;;  %390 = vst.msk [vmem:[%s1667_s24 + $0x28] sm:$0xff] (%p379_p3), %vm384_vm0, %v1576_v0 }
  0x2d   : > { %s1983_s15 = smov (!%p334_p4, %s333_s15), 3  ;;  %s367_s27 = sadd.s32 %s1259_s26, %s1981_s12  ;;  %391 = vst.msk [vmem:[%s1667_s24 + $0x30] sm:$0xff] (%p379_p3), %vm384_vm0, %v1576_v0  ;;  %392 = vst.msk [vmem:[%s1667_s24 + $0x38] sm:$0xff] (%p379_p3), %vm384_vm0, %v1576_v0 }
  0x2e   : > { %s1314_s28 = sshll.u32 %s1983_s15, 4  ;;  %s1260_s29 = sshll.u32 %s367_s27, 3  ;;  %393 = vst.msk [vmem:[%s1667_s24 + $0x40] sm:$0xff] (%p379_p3), %vm384_vm0, %v1576_v0  ;;  %394 = vst.msk [vmem:[%s1667_s24 + $0x48] sm:$0xff] (%p379_p3), %vm384_vm0, %v1576_v0 }
  0x2f   : > { %s341_s13 = scalar_lea.vmem %s1965_s3, %s1314_s28  ;;  %s1676_s20 = scalar_lea.vmem %s1967_s5, %s1260_s29  ;;  %395 = vst.msk [vmem:[%s1667_s24 + $0x50] sm:$0xff] (%p379_p3), %vm384_vm0, %v1576_v0  ;;  %396 = vst.msk [vmem:[%s1667_s24 + $0x58] sm:$0xff] (%p379_p3), %vm384_vm0, %v1576_v0 }
  0x30   : > { %s1985_s16 = smov (!%p349_p5, %s347_s16), 3  ;;  %383 = sbr.rel (!%p379_p3) target bundleno = 53 (0x35), region = 40  ;;  %397 = vst.msk [vmem:[%s1667_s24 + $0x60] sm:$0xff] (%p379_p3), %vm384_vm0, %v1576_v0  ;;  %398 = vst.msk [vmem:[%s1667_s24 + $0x68] sm:$0xff] (%p379_p3), %vm384_vm0, %v1576_v0 }
  0x31   : > { %s1315_s18 = sshll.u32 %s1985_s16, 5  ;;  %399 = vst.msk [vmem:[%s1667_s24 + $0x70] sm:$0xff] (%p379_p3), %vm384_vm0, %v1576_v0  ;;  %400 = vst.msk [vmem:[%s1667_s24 + $0x78] sm:$0xff] (%p379_p3), %vm384_vm0, %v1576_v0 }
  0x32   : > { %s1681_s25 = scalar_lea.vmem %s1966_s4, %s1315_s18 }
  0x35 PF: > { %s403_s1 = sld [smem:[#allocation3 + %s1653_s14]] }
  0x3b   : > { %p1265_p6 = scmp.eq.s32.totalorder %s403_s1, 0 }
  0x3c   : > { %s1578_s12 = smov (!%p1265_p6), 64  }
  0x3d   : > { %407 = sbr.rel (%p1265_p6) target bundleno = 636 (0x27c), region = 44 }
  0x42   : > { %v1430_v1 = vld [vmem:[%s341_s13 + $0x8] sm:$0xff]   ;;  %vm480_vm1 = vcmask 261120   ;;  %v1431_v2 = vld [vmem:[%s341_s13] sm:$0xff]   ;;  %v1577_v4 = vmov 0   ;;  %v1434_v6 = vld [vmem:[%s1662_s21 + $0x10] sm:$0xff]   ;;  %vm962_vm2 = vcmask 523264  }
  0x43   : > { %1339 = vmatprep.subr.bf16.mxu0 %v1430_v1  ;;  %v1432_v3 = vld [vmem:[%s1662_s21] sm:$0xff]   ;;  %1429 = vset.pattern.permute.xlu1 %v1577_v4  ;;  %v1433_v5 = vld [vmem:[%s1662_s21 + $0x8] sm:$0xff]   ;;  %v796_v7 = vld [vmem:[%s1676_s20 + $0x10] sm:$0xff] }
  0x44   : > { %1340 = vmatpush3.bf16.msra.mxu0 %v1430_v1  ;;  %1428 = vset.pattern.permute.xlu0 %v1577_v4  ;;  %v794_v8 = vld [vmem:[%s1676_s20] sm:$0xff]  ;;  %v797_v9 = vld [vmem:[%s1676_s20 + $0x18] sm:$0xff]  ;;  %v795_v11 = vld [vmem:[%s1676_s20 + $0x8] sm:$0xff] }
  0x45   : > { %1341 = vmatprep.subr.bf16.mxu0 %v1431_v2  ;;  %1343 = vmatprep.mubr.msk.bf16.mxu0 %vm480_vm1, %v1432_v3  ;;  %v1435_v10 = vld [vmem:[%s1662_s21 + $0x18] sm:$0xff]   ;;  %v1436_v12 = vld [vmem:[%s1662_s21 + $0x20] sm:$0xff]   ;;  %v799_v13 = vld [vmem:[%s1676_s20 + $0x28] sm:$0xff] }
  0x46   : > { %822 = vperm.xlu1 %1429, %v796_v7   ;;  %812 = vperm.xlu0 %1428, %v794_v8   ;;  %v798_v14 = vld [vmem:[%s1676_s20 + $0x20] sm:$0xff]  ;;  %v801_v15 = vld [vmem:[%s1676_s20 + $0x38] sm:$0xff]  ;;  %v800_v16 = vld [vmem:[%s1676_s20 + $0x30] sm:$0xff] }
  0x47   : > { %v1437_v17 = vld [vmem:[%s1662_s21 + $0x28] sm:$0xff]   ;;  %v1438_v18 = vld [vmem:[%s1662_s21 + $0x30] sm:$0xff]   ;;  %v802_v20 = vld [vmem:[%s1676_s20 + $0x40] sm:$0xff] }
  0x48   : > { %1342 = vmatpush3.bf16.msra.mxu0 %v1431_v2  ;;  %v803_v19 = vld [vmem:[%s1676_s20 + $0x48] sm:$0xff]  ;;  %v805_v21 = vld [vmem:[%s1676_s20 + $0x58] sm:$0xff]  ;;  %v804_v22 = vld [vmem:[%s1676_s20 + $0x50] sm:$0xff] }
  0x49   : > { %v1439_v23 = vld [vmem:[%s1662_s21 + $0x38] sm:$0xff]   ;;  %v807_v24 = vld [vmem:[%s1676_s20 + $0x68] sm:$0xff]  ;;  %v806_v25 = vld [vmem:[%s1676_s20 + $0x60] sm:$0xff] }
  0x4a   : > { %827 = vperm.xlu1 %1429, %v797_v9   ;;  %817 = vperm.xlu0 %1428, %v795_v11   ;;  %v1440_v26 = vld [vmem:[%s1681_s25 + $0x18] sm:$0xff]   ;;  %v1441_v27 = vld [vmem:[%s1681_s25 + $0x10] sm:$0xff]   ;;  %v1442_v28 = vld [vmem:[%s1681_s25 + $0x8] sm:$0xff]  }
  0x4b   : > { %1344 = vmatmul.mubr.msk.bf16.vlgmr.msra.gmra.mxu0 %vm480_vm1, %v1433_v5  ;;  %1359 = vmatprep.subr.bf16.mxu1 %v1440_v26  ;;  %v1443_v29 = vld [vmem:[%s1681_s25] sm:$0xff]   ;;  %v808_v42 = vld [vmem:[%s1676_s20 + $0x70] sm:$0xff]  ;;  %v809_v45 = vld [vmem:[%s1676_s20 + $0x78] sm:$0xff] }
  0x4c   : > { %1347 = vmatprep.mubr.msk.bf16.mxu0 %vm480_vm1, %v1434_v6  ;;  %1360 = vmatpush3.bf16.msra.mxu1 %v1440_v26 }
  0x4d   : > { %1361 = vmatprep.subr.bf16.mxu1 %v1441_v27 }
  0x4e   : > { %837 = vperm.xlu1 %1429, %v799_v13   ;;  %832 = vperm.xlu0 %1428, %v798_v14  }
  0x50   : > { %1362 = vmatpush3.bf16.msra.mxu1 %v1441_v27 }
  0x51   : > { %1363 = vmatprep.subr.bf16.mxu1 %v1442_v28 }
  0x52   : > { %847 = vperm.xlu1 %1429, %v801_v15   ;;  %842 = vperm.xlu0 %1428, %v800_v16  }
  0x53   : > { %1348 = vmatmul.mubr.msk.bf16.gmra.mxu0 %vm480_vm1, %v1435_v10 }
  0x54   : > { %1351 = vmatprep.mubr.msk.bf16.mxu0 %vm480_vm1, %v1436_v12  ;;  %1364 = vmatpush3.bf16.msra.mxu1 %v1442_v28 }
  0x55   : > { %1365 = vmatprep.subr.bf16.mxu1 %v1443_v29 }
  0x56   : > { %857 = vperm.xlu1 %1429, %v803_v19   ;;  %852 = vperm.xlu0 %1428, %v802_v20  }
  0x58   : > { %1366 = vmatpush3.bf16.msra.mxu1 %v1443_v29 }
  0x5a   : > { %867 = vperm.xlu1 %1429, %v805_v21   ;;  %862 = vperm.xlu0 %1428, %v804_v22  }
  0x5b   : > { %1352 = vmatmul.mubr.msk.bf16.gmra.mxu0 %vm480_vm1, %v1437_v17 }
  0x5c   : > { %1355 = vmatprep.mubr.msk.bf16.mxu0 %vm480_vm1, %v1438_v18 }
  0x5e   : > { %877 = vperm.xlu1 %1429, %v807_v24   ;;  %872 = vperm.xlu0 %1428, %v806_v25  }
  0x63   : > { %1356 = vmatmul.mubr.msk.bf16.gmra.mxu0 %vm480_vm1, %v1439_v23 }
  0xc1   : > { %v1819_v49 = vpop.permute.xlu0 %812  ;;  %v1822_v51 = vpop.permute.xlu1 %822 }
  0xc5   : > { %v1826_v54 = vpop.permute.xlu0 %817  ;;  %v1829_v56 = vpop.permute.xlu1 %827 }
  0xc9   : > { %v1832_v58 = vpop.permute.xlu0 %832  ;;  %v1836_v61 = vpop.permute.xlu1 %837 }
  0xcd   : > { %v1839_v0 = vpop.permute.xlu0 %842  ;;  %v1843_v7 = vpop.permute.xlu1 %847 }
  0xd1   : > { %v1846_v10 = vpop.permute.xlu0 %852  ;;  %v1848_v15 = vpop.permute.xlu1 %857 }
  0xd5   : > { %v1850_v18 = vpop.permute.xlu0 %862  ;;  %v1852_v23 = vpop.permute.xlu1 %867 }
  0xd9   : > { %v1854_v26 = vpop.permute.xlu0 %872 }
 0x10b   : > { %v1752_v30 = vpop.f32.mrf.mxu0 }
 0x10c   : > { %734 = vrot.lane.b32.xlu0 %v1752_v30, %s1578_s12  ;;  %v1286_v48 = vmul.f32 -1.442695, %v1752_v30 }
 0x10d   : > { %v1756_v31 = vpop.f32.mrf.mxu0 }
 0x10e   : > { %1444 = vpow2.f32 %v1286_v48  ;;  %v1284_v52 = vmul.f32 -1.442695, %v1756_v31 }
 0x10f   : > { %v1758_v32 = vpop.f32.mrf.mxu0 }
 0x110   : > { %730 = vrot.lane.b32.xlu0 %v1756_v31, %s1578_s12  ;;  %736 = vrot.lane.b32.xlu1 %v1758_v32, %s1578_s12  ;;  %v1287_v50 = vmul.f32 -1.442695, %v1758_v32 }
 0x111   : > { %v1764_v33 = vpop.f32.mrf.mxu0 }
 0x112   : > { %1446 = vpow2.f32 %v1287_v50  ;;  %v1285_v53 = vmul.f32 -1.442695, %v1764_v33 }
 0x113   : > { %v1766_v34 = vpop.f32.mrf.mxu0  ;;  %1448 = vpow2.f32 %v1284_v52 }
 0x114   : > { %732 = vrot.lane.b32.xlu1 %v1764_v33, %s1578_s12  ;;  %742 = vrot.lane.b32.xlu0 %v1766_v34, %s1578_s12  ;;  %v1290_v55 = vmul.f32 -1.442695, %v1766_v34  ;;  %1450 = vpow2.f32 %v1285_v53  ;;  %v1858_v53 = vpop.permute.xlu1 %877 }
 0x115   : > { %v1772_v35 = vpop.f32.mrf.mxu0 }
 0x116   : > { %1452 = vpow2.f32 %v1290_v55  ;;  %v1288_v59 = vmul.f32 -1.442695, %v1772_v35 }
 0x117   : > { %v1774_v36 = vpop.f32.mrf.mxu0 }
 0x118   : > { %738 = vrot.lane.b32.xlu0 %v1772_v35, %s1578_s12  ;;  %744 = vrot.lane.b32.xlu1 %v1774_v36, %s1578_s12  ;;  %v1291_v57 = vmul.f32 -1.442695, %v1774_v36 }
 0x119   : > { %v1780_v37 = vpop.f32.mrf.mxu0 }
 0x11a   : > { %1454 = vpow2.f32 %v1291_v57  ;;  %v1289_v60 = vmul.f32 -1.442695, %v1780_v37 }
 0x11b   : > { %v1782_v38 = vpop.f32.mrf.mxu0  ;;  %v1445_v62 = vpop.eup %1444  ;;  %1456 = vpow2.f32 %v1288_v59 }
 0x11c   : > { %740 = vrot.lane.b32.xlu1 %v1780_v37, %s1578_s12  ;;  %750 = vrot.lane.b32.xlu0 %v1782_v38, %s1578_s12  ;;  %v1294_v63 = vmul.f32 -1.442695, %v1782_v38  ;;  %1458 = vpow2.f32 %v1289_v60  ;;  %v652_v3 = vadd.f32 1.0, %v1445_v62 }
 0x11d   : > { %v1788_v39 = vpop.f32.mrf.mxu0 }
 0x11e   : > { %1460 = vpow2.f32 %v1294_v63  ;;  %v1292_v4 = vmul.f32 -1.442695, %v1788_v39 }
 0x11f   : > { %v1790_v40 = vpop.f32.mrf.mxu0  ;;  %v1447_v1 = vpop.eup %1446 }
 0x120   : > { %746 = vrot.lane.b32.xlu0 %v1788_v39, %s1578_s12  ;;  %752 = vrot.lane.b32.xlu1 %v1790_v40, %s1578_s12  ;;  %v1295_v2 = vmul.f32 -1.442695, %v1790_v40  ;;  %v1449_v5 = vpop.eup %1448  ;;  %v653_v6 = vadd.f32 1.0, %v1447_v1 }
 0x121   : > { %v1796_v41 = vpop.f32.mrf.mxu0  ;;  %v1451_v8 = vpop.eup %1450  ;;  %v650_v11 = vadd.f32 1.0, %v1449_v5 }
 0x122   : > { %1462 = vpow2.f32 %v1295_v2  ;;  %v1293_v9 = vmul.f32 -1.442695, %v1796_v41  ;;  %v651_v13 = vadd.f32 1.0, %v1451_v8 }
 0x123   : > { %v1799_v43 = vpop.f32.mrf.mxu0  ;;  %1464 = vrcp.f32 %v652_v3  ;;  %v1453_v12 = vpop.eup %1452 }
 0x124   : > { %882 = vperm.xlu0 %1428, %v808_v42   ;;  %748 = vrot.lane.b32.xlu1 %v1796_v41, %s1578_s12  ;;  %1466 = vpow2.f32 %v1292_v4  ;;  %v656_v16 = vadd.f32 1.0, %v1453_v12  ;;  %v1298_v62 = vmul.f32 -1.442695, %v1799_v43 }
 0x125   : > { %v1803_v44 = vpop.f32.mrf.mxu0  ;;  %1468 = vrcp.f32 %v653_v6 }
 0x126   : > { %1470 = vpow2.f32 %v1293_v9  ;;  %v1296_v42 = vmul.f32 -1.442695, %v1803_v44 }
 0x127   : > { %v1806_v46 = vpop.f32.mrf.mxu0  ;;  %v1455_v14 = vpop.eup %1454  ;;  %1472 = vrcp.f32 %v650_v11 }
 0x128   : > { %887 = vperm.xlu1 %1429, %v809_v45   ;;  %754 = vrot.lane.b32.xlu0 %v1803_v44, %s1578_s12  ;;  %v1457_v17 = vpop.eup %1456  ;;  %1474 = vrcp.f32 %v651_v13  ;;  %v657_v19 = vadd.f32 1.0, %v1455_v14  ;;  %v1299_v4 = vmul.f32 -1.442695, %v1806_v46 }
 0x129   : > { %v1810_v47 = vpop.f32.mrf.mxu0  ;;  %v1459_v20 = vpop.eup %1458  ;;  %1476 = vrcp.f32 %v656_v16  ;;  %v654_v21 = vadd.f32 1.0, %v1457_v17 }
 0x12a   : > { %1478 = vrcp.f32 %v657_v19  ;;  %v655_v24 = vadd.f32 1.0, %v1459_v20  ;;  %v1297_v52 = vmul.f32 -1.442695, %v1810_v47 }
 0x12b   : > { %v1461_v22 = vpop.eup %1460  ;;  %1480 = vrcp.f32 %v654_v21 }
 0x12c   : > { %756 = vrot.lane.b32.xlu1 %v1810_v47, %s1578_s12  ;;  %758 = vrot.lane.b32.xlu0 %v1799_v43, %s1578_s12  ;;  %v660_v28 = vadd.f32 1.0, %v1461_v22  ;;  %1482 = vrcp.f32 %v655_v24 }
 0x12e   : > { %1484 = vrcp.f32 %v660_v28 }
 0x12f   : > { %v1463_v25 = vpop.eup %1462  ;;  %1486 = vpow2.f32 %v1296_v42 }
 0x130   : > { %760 = vrot.lane.b32.xlu1 %v1806_v46, %s1578_s12  ;;  %v1465_v27 = vpop.eup %1464  ;;  %v661_v48 = vadd.f32 1.0, %v1463_v25 }
 0x131   : > { %v1467_v29 = vpop.eup %1466  ;;  %v700_v59 = vmul.f32 %v1465_v27, %v1752_v30 }
 0x132   : > { %v1469_v45 = vpop.eup %1468  ;;  %v658_v57 = vadd.f32 1.0, %v1467_v29  ;;  %1488 = vrcp.f32 %v661_v48 }
 0x133   : > { %v1471_v50 = vpop.eup %1470  ;;  %v701_v3 = vmul.f32 %v1469_v45, %v1758_v32  ;;  %1490 = vpow2.f32 %v1297_v52 }
 0x134   : > { %v1473_v60 = vpop.eup %1472  ;;  %v659_v1 = vadd.f32 1.0, %v1471_v50  ;;  %1492 = vrcp.f32 %v658_v57 }
 0x135   : > { %v1475_v63 = vpop.eup %1474  ;;  %v698_v8 = vmul.f32 %v1473_v60, %v1756_v31  ;;  %1494 = vpow2.f32 %v1298_v62 }
 0x136   : > { %v1477_v30 = vpop.eup %1476  ;;  %v699_v11 = vmul.f32 %v1475_v63, %v1764_v33  ;;  %1496 = vrcp.f32 %v659_v1 }
 0x137   : > { %v1479_v32 = vpop.eup %1478  ;;  %1498 = vpow2.f32 %v1299_v4  ;;  %v704_v21 = vmul.f32 %v1477_v30, %v1766_v34 }
 0x138   : > { %v1481_v31 = vpop.eup %1480  ;;  %v705_v25 = vmul.f32 %v1479_v32, %v1774_v36 }
 0x17e   : > { %v735_v55 = vpop.permute.xlu0 %734 }
 0x17f   : > { %v780_v2 = vmul.f32 %v735_v55, %v700_v59 }
 0x181   : > { %v892_v12 = vmul.f32 %v1822_v51, %v780_v2  ;;  %v1483_v51 = vpop.eup %1482 }
 0x182   : > { %v731_v5 = vpop.permute.xlu0 %730  ;;  %v737_v6 = vpop.permute.xlu1 %736 }
 0x183   : > { %v781_v9 = vmul.f32 %v737_v6, %v701_v3  ;;  %v778_v13 = vmul.f32 %v731_v5, %v698_v8  ;;  %v1485_v45 = vpop.eup %1484 }
 0x184   : > { %v1487_v48 = vpop.eup %1486  ;;  %v708_v60 = vmul.f32 %v1485_v45, %v1782_v38 }
 0x185   : > { %v893_v14 = vmul.f32 %v1829_v56, %v781_v9  ;;  %v890_v22 = vmul.f32 %v1819_v49, %v778_v13  ;;  %v702_v56 = vmul.f32 %v1481_v31, %v1772_v35  ;;  %v1489_v36 = vpop.eup %1488  ;;  %v662_v63 = vadd.f32 1.0, %v1487_v48 }
 0x186   : > { %v733_v16 = vpop.permute.xlu1 %732  ;;  %v743_v17 = vpop.permute.xlu0 %742 }
 0x187   : > { %v907_v19 = vpack.c.bf16 %v893_v14, %v892_v12  ;;  %v779_v20 = vmul.f32 %v733_v16, %v699_v11  ;;  %v784_v33 = vmul.f32 %v743_v17, %v704_v21  ;;  %v1491_v57 = vpop.eup %1490  ;;  %1500 = vrcp.f32 %v662_v63  ;;  %v918_v63 = vld [vmem:[%s1667_s24 + $0x20] sm:$0xff] }
 0x188   : > { %v1493_v62 = vpop.eup %1492  ;;  %v663_v4 = vadd.f32 1.0, %v1491_v57 }
 0x189   : > { %v891_v24 = vmul.f32 %v1826_v54, %v779_v20  ;;  %v896_v34 = vmul.f32 %v1839_v0, %v784_v33  ;;  %v703_v54 = vmul.f32 %v1483_v51, %v1780_v37  ;;  %v1495_v0 = vpop.eup %1494  ;;  %v709_v37 = vmul.f32 %v1489_v36, %v1790_v40 }
 0x18a   : > { %v739_v27 = vpop.permute.xlu0 %738  ;;  %v745_v28 = vpop.permute.xlu1 %744  ;;  %v706_v30 = vmul.f32 %v1493_v62, %v1788_v39  ;;  %v664_v38 = vadd.f32 1.0, %v1495_v0  ;;  %1502 = vrcp.f32 %v663_v4 }
 0x18b   : > { %v785_v29 = vmul.f32 %v745_v28, %v705_v25  ;;  %v906_v42 = vpack.c.bf16 %v891_v24, %v890_v22  ;;  %v782_v50 = vmul.f32 %v739_v27, %v702_v56  ;;  %v1497_v3 = vpop.eup %1496 }
 0x18c   : > { %v1499_v8 = vpop.eup %1498  ;;  %v707_v40 = vmul.f32 %v1497_v3, %v1796_v41  ;;  %1504 = vrcp.f32 %v664_v38  ;;  %v919_v3 = vld [vmem:[%s1667_s24 + $0x28] sm:$0xff] }
 0x18d   : > { %v897_v49 = vmul.f32 %v1843_v7, %v785_v29  ;;  %1367 = vmatprep.mubr.msk.bf16.mxu1 %vm962_vm2, %v906_v42  ;;  %v894_v1 = vmul.f32 %v1832_v58, %v782_v50 }
 0x18e   : > { %1368 = vmatmul.mubr.msk.bf16.vlgmr.msra.gmra.mxu1 %vm962_vm2, %v907_v19  ;;  %v741_v52 = vpop.permute.xlu1 %740  ;;  %v751_v55 = vpop.permute.xlu0 %750 }
 0x18f   : > { %v909_v35 = vpack.c.bf16 %v897_v49, %v896_v34  ;;  %v783_v59 = vmul.f32 %v741_v52, %v703_v54  ;;  %v788_v2 = vmul.f32 %v751_v55, %v708_v60  ;;  %v917_v54 = vld [vmem:[%s1667_s24 + $0x18] sm:$0xff]  ;;  %v915_v55 = vld [vmem:[%s1667_s24 + $0x8] sm:$0xff] }
 0x191   : > { %v895_v7 = vmul.f32 %v1836_v61, %v783_v59  ;;  %v900_v12 = vmul.f32 %v1850_v18, %v788_v2  ;;  %v665_v61 = vadd.f32 1.0, %v1499_v8  ;;  %v920_v59 = vld [vmem:[%s1667_s24 + $0x30] sm:$0xff] }
 0x192   : > { %v747_v5 = vpop.permute.xlu0 %746  ;;  %v753_v6 = vpop.permute.xlu1 %752 }
 0x193   : > { %v908_v9 = vpack.c.bf16 %v895_v7, %v894_v1  ;;  %v789_v11 = vmul.f32 %v753_v6, %v709_v37  ;;  %v786_v13 = vmul.f32 %v747_v5, %v706_v30  ;;  %1506 = vrcp.f32 %v665_v61  ;;  %v921_v7 = vld [vmem:[%s1667_s24 + $0x38] sm:$0xff]  ;;  %v924_v6 = vld [vmem:[%s1667_s24 + $0x50] sm:$0xff]  ;;  %v922_v30 = vld [vmem:[%s1667_s24 + $0x40] sm:$0xff] }
 0x194   : > { %v1501_v41 = vpop.eup %1500 }
 0x195   : > { %v901_v58 = vmul.f32 %v1852_v23, %v789_v11  ;;  %1371 = vmatprep.mubr.msk.bf16.mxu1 %vm962_vm2, %v908_v9  ;;  %v898_v39 = vmul.f32 %v1846_v10, %v786_v13  ;;  %v710_v31 = vmul.f32 %v1501_v41, %v1803_v44  ;;  %v929_v41 = vld [vmem:[%s1667_s24 + $0x78] sm:$0xff] }
 0x196   : > { %1372 = vmatmul.mubr.msk.bf16.gmra.mxu1 %vm962_vm2, %v909_v35  ;;  %v749_v14 = vpop.permute.xlu1 %748 }
 0x197   : > { %v911_v32 = vpack.c.bf16 %v901_v58, %v900_v12  ;;  %v787_v16 = vmul.f32 %v749_v14, %v707_v40  ;;  %v1503_v19 = vpop.eup %1502  ;;  %v925_v12 = vld [vmem:[%s1667_s24 + $0x58] sm:$0xff]  ;;  %v923_v40 = vld [vmem:[%s1667_s24 + $0x48] sm:$0xff] }
 0x198   : > { %v711_v24 = vmul.f32 %v1503_v19, %v1810_v47 }
 0x199   : > { %v899_v17 = vmul.f32 %v1848_v15, %v787_v16  ;;  %v1505_v22 = vpop.eup %1504  ;;  %v928_v16 = vld [vmem:[%s1667_s24 + $0x70] sm:$0xff] }
 0x19a   : > { %v712_v51 = vmul.f32 %v1505_v22, %v1799_v43 }
 0x19b   : > { %v910_v18 = vpack.c.bf16 %v899_v17, %v898_v39  ;;  %v926_v17 = vld [vmem:[%s1667_s24 + $0x60] sm:$0xff] }
 0x19d   : > { %1375 = vmatprep.mubr.msk.bf16.mxu1 %vm962_vm2, %v910_v18 }
 0x19e   : > { %1376 = vmatmul.mubr.msk.bf16.gmra.mxu1 %vm962_vm2, %v911_v32 }
 0x19f   : > { %v883_v23 = vpop.permute.xlu0 %882 }
 0x1a0   : > { %v1507_v10 = vpop.eup %1506 }
 0x1a1   : > { %v713_v44 = vmul.f32 %v1507_v10, %v1806_v46 }
 0x1a3   : > { %v888_v20 = vpop.permute.xlu1 %887  ;;  %v755_v21 = vpop.permute.xlu0 %754 }
 0x1a4   : > { %v790_v33 = vmul.f32 %v755_v21, %v710_v31  ;;  %v927_v21 = vld [vmem:[%s1667_s24 + $0x68] sm:$0xff] }
 0x1a6   : > { %v902_v28 = vmul.f32 %v1854_v26, %v790_v33  ;;  %v916_v26 = vld [vmem:[%s1667_s24 + $0x10] sm:$0xff] }
 0x1a7   : > { %v759_v25 = vpop.permute.xlu0 %758  ;;  %v757_v15 = vpop.permute.xlu1 %756 }
 0x1a8   : > { %v791_v27 = vmul.f32 %v757_v15, %v711_v24  ;;  %v792_v56 = vmul.f32 %v759_v25, %v712_v51 }
 0x1aa   : > { %v903_v29 = vmul.f32 %v1858_v53, %v791_v27  ;;  %v904_v48 = vmul.f32 %v883_v23, %v792_v56  ;;  %v914_v53 = vld [vmem:[%s1667_s24] sm:$0xff] }
 0x1ab   : > { %v761_v42 = vpop.permute.xlu1 %760 }
 0x1ac   : > { %v912_v47 = vpack.c.bf16 %v903_v29, %v902_v28  ;;  %v793_v45 = vmul.f32 %v761_v42, %v713_v44 }
 0x1ae   : > { %v905_v34 = vmul.f32 %v888_v20, %v793_v45  ;;  %1379 = vmatprep.mubr.msk.bf16.mxu1 %vm962_vm2, %v912_v47 }
 0x1b0   : > { %v913_v43 = vpack.c.bf16 %v905_v34, %v904_v48 }
 0x1b2   : > { %1380 = vmatmul.mubr.msk.bf16.gmra.mxu1 %vm962_vm2, %v913_v43 }
 0x24e   : > { %v1369_v50 = vpop.f32.mrf.mxu1 }
 0x24f   : > { %v1086_v46 = vadd.f32 %v1369_v50, %v916_v26 }
 0x250   : > { %v1021_v49 = vpop.f32.mrf.mxu1 }
 0x251   : > { %1102 = vst.msk [vmem:[%s1667_s24 + $0x10] sm:$0xff] %vm480_vm1, %v1086_v46  ;;  %v1084_v36 = vadd.f32 %v1021_v49, %v914_v53 }
 0x252   : > { %v1370_v52 = vpop.f32.mrf.mxu1 }
 0x253   : > { %1100 = vst.msk [vmem:[%s1667_s24] sm:$0xff] %vm480_vm1, %v1084_v36  ;;  %v1087_v57 = vadd.f32 %v1370_v52, %v917_v54 }
 0x254   : > { %v1024_v35 = vpop.f32.mrf.mxu1 }
 0x255   : > { %1103 = vst.msk [vmem:[%s1667_s24 + $0x18] sm:$0xff] %vm480_vm1, %v1087_v57  ;;  %v1085_v60 = vadd.f32 %v1024_v35, %v915_v55 }
 0x256   : > { %v1373_v62 = vpop.f32.mrf.mxu1 }
 0x257   : > { %1101 = vst.msk [vmem:[%s1667_s24 + $0x8] sm:$0xff] %vm480_vm1, %v1085_v60  ;;  %v1090_v0 = vadd.f32 %v1373_v62, %v920_v59 }
 0x258   : > { %v1037_v1 = vpop.f32.mrf.mxu1 }
 0x259   : > { %1106 = vst.msk [vmem:[%s1667_s24 + $0x30] sm:$0xff] %vm480_vm1, %v1090_v0  ;;  %v1088_v2 = vadd.f32 %v1037_v1, %v918_v63 }
 0x25a   : > { %v1374_v37 = vpop.f32.mrf.mxu1 }
 0x25b   : > { %1104 = vst.msk [vmem:[%s1667_s24 + $0x20] sm:$0xff] %vm480_vm1, %v1088_v2  ;;  %v1091_v4 = vadd.f32 %v1374_v37, %v921_v7 }
 0x25c   : > { %v1040_v5 = vpop.f32.mrf.mxu1 }
 0x25d   : > { %1107 = vst.msk [vmem:[%s1667_s24 + $0x38] sm:$0xff] %vm480_vm1, %v1091_v4  ;;  %v1089_v8 = vadd.f32 %v1040_v5, %v919_v3 }
 0x25e   : > { %v1377_v9 = vpop.f32.mrf.mxu1 }
 0x25f   : > { %1105 = vst.msk [vmem:[%s1667_s24 + $0x28] sm:$0xff] %vm480_vm1, %v1089_v8  ;;  %v1094_v11 = vadd.f32 %v1377_v9, %v924_v6 }
 0x260   : > { %v1053_v38 = vpop.f32.mrf.mxu1 }
 0x261   : > { %1110 = vst.msk [vmem:[%s1667_s24 + $0x50] sm:$0xff] %vm480_vm1, %v1094_v11  ;;  %v1092_v13 = vadd.f32 %v1053_v38, %v922_v30 }
 0x262   : > { %v1378_v58 = vpop.f32.mrf.mxu1 }
 0x263   : > { %1108 = vst.msk [vmem:[%s1667_s24 + $0x40] sm:$0xff] %vm480_vm1, %v1092_v13  ;;  %v1095_v61 = vadd.f32 %v1378_v58, %v925_v12 }
 0x264   : > { %v1056_v14 = vpop.f32.mrf.mxu1 }
 0x265   : > { %1111 = vst.msk [vmem:[%s1667_s24 + $0x58] sm:$0xff] %vm480_vm1, %v1095_v61  ;;  %v1093_v32 = vadd.f32 %v1056_v14, %v923_v40 }
 0x267   : > { %1109 = vst.msk [vmem:[%s1667_s24 + $0x48] sm:$0xff] %vm480_vm1, %v1093_v32 }
 0x272   : > { %v1381_v39 = vpop.f32.mrf.mxu1 }
 0x273   : > { %v1098_v18 = vadd.f32 %v1381_v39, %v928_v16 }
 0x274   : > { %v1069_v23 = vpop.f32.mrf.mxu1 }
 0x275   : > { %1114 = vst.msk [vmem:[%s1667_s24 + $0x70] sm:$0xff] %vm480_vm1, %v1098_v18  ;;  %v1096_v19 = vadd.f32 %v1069_v23, %v926_v17 }
 0x276   : > { %v1382_v20 = vpop.f32.mrf.mxu1 }
 0x277   : > { %1112 = vst.msk [vmem:[%s1667_s24 + $0x60] sm:$0xff] %vm480_vm1, %v1096_v19  ;;  %v1099_v31 = vadd.f32 %v1382_v20, %v929_v41 }
 0x278   : > { %v1072_v22 = vpop.f32.mrf.mxu1 }
 0x279   : > { %1115 = vst.msk [vmem:[%s1667_s24 + $0x78] sm:$0xff] %vm480_vm1, %v1099_v31  ;;  %v1097_v24 = vadd.f32 %v1072_v22, %v927_v21 }
 0x27b   : > { %1113 = vst.msk [vmem:[%s1667_s24 + $0x68] sm:$0xff] %vm480_vm1, %v1097_v24 }
 0x27c PF: > { %s26_s9 = sadd.s32 1, %s1572_s9   ;;  %s1970_s1 = smov %s1564_s7 }
 0x27d   : > { %p23_p7 = scmp.ge.s32.totalorder %s26_s9, 10   ;;  %s1971_s30 = smov %s1568_s8 }
 0x27e   : > { %s1972_s7 = smov %s1975_s10  ;;  %s1973_s8 = smov %s1979_s11 }
 0x27f   :  { %25 = sbr.rel (!%p23_p7) target bundleno = 28 (0x1c), region = 83 }

</bundles_post_ra>
